<compile_context>
chip_gen: v7x
topology: tpu7x:2x2x1
jax: 0.10.0
libtpu: 0.0.40
codegen_flags: <defaults>
</compile_context>

<pallas_src>
import jax
import jax.numpy as jnp
from jax.experimental import pallas as pl
from jax.experimental.pallas import tpu as pltpu


# ---------------------------------------------------------------------------
# Kernels
# ---------------------------------------------------------------------------

def _whole_image_kernel(img_ref, nxmask_ref, nymask_ref, depth_ref, normals_ref):
    """bt whole images resident per grid step; min/max normalization fused."""
    r = img_ref[:, 0]                                   # (bt, H, W)
    g = img_ref[:, 1]
    b = img_ref[:, 2]
    # Raw depth proxy: channel mean (stands in for the backbone, see TODO).
    d = (r + g + b) * (1.0 / 3.0)

    dmin = jnp.min(d, axis=(1, 2), keepdims=True)       # (bt, 1, 1)
    dmax = jnp.max(d, axis=(1, 2), keepdims=True)
    d = (d - dmin) * (1.0 / (dmax - dmin + 1e-8))

    bt, h, w = d.shape
    # Central differences via XLU rolls (non-negative shifts only).  Wrapped
    # border columns/rows are zeroed by the masks, which also carry the folded
    # -0.5 factor, so the products directly give -grad_x / -grad_y.
    right = pltpu.roll(d, shift=w - 1, axis=2)          # d[:, :, j+1]
    left = pltpu.roll(d, shift=1, axis=2)               # d[:, :, j-1]
    down = pltpu.roll(d, shift=h - 1, axis=1)           # d[:, i+1, :]
    up = pltpu.roll(d, shift=1, axis=1)                 # d[:, i-1, :]
    ngx = (right - left) * nxmask_ref[...]              # == -grad_x
    ngy = (down - up) * nymask_ref[...]                 # == -grad_y

    # normals = (-gx, -gy, 1)/||.||; squared norm >= 1 so rsqrt is exact-safe.
    inv = jax.lax.rsqrt(ngx * ngx + ngy * ngy + 1.0)

    depth_ref[:, 0] = d
    normals_ref[:, 0] = ngx * inv
    normals_ref[:, 1] = ngy * inv
    normals_ref[:, 2] = inv


def _row_tiled_kernel(dmin_ref, scale_ref, img_ref, up_ref, dn_ref,
                      nxmask_ref, nymask_ref, depth_ref, normals_ref):
    """Row-tiled pass 2 for images too large to keep resident in VMEM.

    img_ref : (1, 3, th, W) current row tile.
    up_ref  : (1, 3, 8, W)  8-row block containing the row just above the tile.
    dn_ref  : (1, 3, 8, W)  8-row block containing the row just below the tile.
    dmin/scale : per-image f32 (B,) in SMEM (pass-1 reduction done in plain JAX,
                 keeping the full-plane reduces out of this roll-heavy pass).
    """
    b = pl.program_id(0)
    dmin = dmin_ref[b]
    scale = scale_ref[b]
    third = 1.0 / 3.0

    d = (img_ref[:, 0] + img_ref[:, 1] + img_ref[:, 2]) * third   # (1, th, W)
    d = (d - dmin) * scale

    ub = (up_ref[:, 0] + up_ref[:, 1] + up_ref[:, 2]) * third     # (1, 8, W)
    db = (dn_ref[:, 0] + dn_ref[:, 1] + dn_ref[:, 2]) * third
    d_up = (ub[:, 7:8, :] - dmin) * scale                         # row above tile
    d_dn = (db[:, 0:1, :] - dmin) * scale                         # row below tile

    _, th, w = d.shape
    right = pltpu.roll(d, shift=w - 1, axis=2)
    left = pltpu.roll(d, shift=1, axis=2)
    ngx = (right - left) * nxmask_ref[...]                        # == -grad_x

    down = pltpu.roll(d, shift=th - 1, axis=1)   # d[r+1]; wrong at r = th-1
    up = pltpu.roll(d, shift=1, axis=1)          # d[r-1]; wrong at r = 0
    dy = down - up
    row_ids = jax.lax.broadcasted_iota(jnp.int32, (1, th, 1), 1)
    dy = jnp.where(row_ids == 0, d[:, 1:2, :] - d_up, dy)
    dy = jnp.where(row_ids == th - 1, d_dn - d[:, th - 2:th - 1, :], dy)
    # nymask is the slice of the *global*-row mask, so image borders (rows 0
    # and H-1) are zeroed even when they fall inside a tile.
    ngy = dy * nymask_ref[...]                                    # == -grad_y

    inv = jax.lax.rsqrt(ngx * ngx + ngy * ngy + 1.0)

    depth_ref[:, 0] = d
    normals_ref[:, 0] = ngx * inv
    normals_ref[:, 1] = ngy * inv
    normals_ref[:, 2] = inv


# ---------------------------------------------------------------------------
# Budgeting / tiling helpers
# ---------------------------------------------------------------------------

def _vmem_capacity_bytes():
    try:
        info = pltpu.get_tpu_info()
        cap = getattr(info, "vmem_capacity_bytes", None)
        if cap:
            return int(cap)
    except Exception:
        pass
    return 64 << 20   # conservative default (v7x per-core VMEM)


def _round_up(x, m):
    return ((x + m - 1) // m) * m


def _pick_batch_tile(B, per_image_io_bytes, io_budget):
    """Images folded per grid step (amortizes ~0.35us/step grid overhead)."""
    bt = max(1, int(io_budget // max(per_image_io_bytes, 1)))
    bt = min(bt, B)
    if B >= 2:
        bt = min(bt, (B + 1) // 2)        # keep >= 2 grid steps (v7x has 2 TCs)
    # Prefer an exact divisor of B (no padded tail step) unless that gives up
    # more than ~1/3 of the folding; otherwise keep bt and use a cdiv tail.
    for cand in range(bt, 0, -1):
        if B % cand == 0:
            if 3 * cand >= 2 * bt:
                bt = cand
            break
    return bt


def _pick_row_tile(Hp, Wp, io_budget, tile_rows=None):
    if tile_rows is not None:
        th = int(tile_rows)
        assert th % 8 == 0 and Hp % th == 0, \
            "tile_rows must be a multiple of 8 dividing the padded H"
        return th
    per_row_io = 7 * Wp * 4
    want = max(8, int(io_budget // per_row_io))
    nblk = Hp // 8
    best = 8
    for k in range(1, nblk + 1):           # largest mult-of-8 divisor of Hp <= want
        if nblk % k == 0 and 8 * k <= want:
            best = 8 * k
    return best


# ---------------------------------------------------------------------------
# Forward
# ---------------------------------------------------------------------------

def depth_estimator_forward(images, *, force_tiled=False, tile_rows=None):
    """images: [B, 3, H, W] f32 in [0,1] -> (depth [B,1,H,W], normals [B,3,H,W])."""
    B, C, H, W = images.shape
    assert C == 3, "expected RGB input [B, 3, H, W]"
    assert H >= 2 and W >= 2

    # Generation-aware VMEM budget (v5e/v6e: 128 MiB, v7x: 64 MiB).
    vmem_cap = _vmem_capacity_bytes()
    avail = max(vmem_cap - (8 << 20), 16 << 20)            # leave headroom
    io_budget = max(4 << 20, min(16 << 20, avail // 8))    # per-step I/O target

    # Lane-dense outputs: pad W to a multiple of 128 (edge replicate keeps the
    # per-image min/max unchanged); outputs cropped after the kernel.
    Wp = _round_up(W, 128)

    per_image_io = 7 * H * Wp * 4           # 3 input + 1 depth + 3 normal planes
    # Whole-image residency footprint: 2x double-buffered I/O + ~6 f32 planes.
    whole_fit = 20 * H * Wp * 4 <= avail
    use_tiled = force_tiled or not whole_fit

    col = jnp.arange(Wp, dtype=jnp.int32)
    # Boundary masks with the -0.5 central-difference factor (and gradient
    # negation) folded in; padded columns (>= W-1) are zeroed.
    nxmask = jnp.where((col >= 1) & (col <= W - 2),
                       jnp.float32(-0.5), jnp.float32(0.0)).reshape(1, Wp)

    if not use_tiled:
        # ---------------- whole-image-resident path ----------------
        imgs = images if Wp == W else jnp.pad(
            images, ((0, 0), (0, 0), (0, 0), (0, Wp - W)), mode="edge")
        row = jnp.arange(H, dtype=jnp.int32)
        nymask = jnp.where((row >= 1) & (row <= H - 2),
                           jnp.float32(-0.5), jnp.float32(0.0)).reshape(H, 1)

        bt = _pick_batch_tile(B, per_image_io, io_budget)
        grid = (pl.cdiv(B, bt),)
        per_step_io = bt * per_image_io
        vmem_limit = int(min(avail, max(32 << 20, 3 * per_step_io + (4 << 20))))

        depth_p, normals_p = pl.pallas_call(
            _whole_image_kernel,
            out_shape=(
                jax.ShapeDtypeStruct((B, 1, H, Wp), jnp.float32),
                jax.ShapeDtypeStruct((B, 3, H, Wp), jnp.float32),
            ),
            grid_spec=pltpu.PrefetchScalarGridSpec(
                num_scalar_prefetch=0,
                grid=grid,
                in_specs=[
                    pl.BlockSpec((bt, 3, H, Wp), lambda i: (i, 0, 0, 0)),
                    pl.BlockSpec((1, Wp), lambda i: (0, 0)),
                    pl.BlockSpec((H, 1), lambda i: (0, 0)),
                ],
                out_specs=[
                    pl.BlockSpec((bt, 1, H, Wp), lambda i: (i, 0, 0, 0)),
                    pl.BlockSpec((bt, 3, H, Wp), lambda i: (i, 0, 0, 0)),
                ],
            ),
            compiler_params=pltpu.CompilerParams(
                dimension_semantics=("parallel",),
                vmem_limit_bytes=vmem_limit,
            ),
        )(imgs, nxmask, nymask)
    else:
        # ---------------- two-pass row-tiled path ----------------
        # Pass 1 (plain JAX): per-image min / scale from the channel-mean
        # depth.  Pass 2 (Pallas): row-tiled normalization + normals with a
        # 1-row halo fetched as the adjacent 8-row block of the image.
        d_raw = jnp.mean(images, axis=1)                   # (B, H, W)
        dmin = jnp.min(d_raw, axis=(1, 2))                 # (B,)
        dmax = jnp.max(d_raw, axis=(1, 2))
        scale = 1.0 / (dmax - dmin + 1e-8)

        Hp = _round_up(H, 8)
        imgs = images if (Wp == W and Hp == H) else jnp.pad(
            images, ((0, 0), (0, 0), (0, Hp - H), (0, Wp - W)), mode="edge")

        row = jnp.arange(Hp, dtype=jnp.int32)
        nymask = jnp.where((row >= 1) & (row <= H - 2),
                           jnp.float32(-0.5), jnp.float32(0.0)).reshape(Hp, 1)

        th = _pick_row_tile(Hp, Wp, io_budget, tile_rows)
        thb = th // 8
        nblk8 = Hp // 8
        grid = (B, Hp // th)

        per_step_io = (7 * th + 48) * Wp * 4
        vmem_limit = int(min(avail, max(32 << 20, 3 * per_step_io + (4 << 20))))

        depth_p, normals_p = pl.pallas_call(
            _row_tiled_kernel,
            out_shape=(
                jax.ShapeDtypeStruct((B, 1, Hp, Wp), jnp.float32),
                jax.ShapeDtypeStruct((B, 3, Hp, Wp), jnp.float32),
            ),
            grid_spec=pltpu.PrefetchScalarGridSpec(
                num_scalar_prefetch=0,
                grid=grid,
                in_specs=[
                    pl.BlockSpec(memory_space=pltpu.MemorySpace.SMEM),  # dmin
                    pl.BlockSpec(memory_space=pltpu.MemorySpace.SMEM),  # scale
                    pl.BlockSpec((1, 3, th, Wp), lambda b, h: (b, 0, h, 0)),
                    pl.BlockSpec((1, 3, 8, Wp),
                                 lambda b, h: (b, 0, jnp.maximum(h * thb - 1, 0), 0)),
                    pl.BlockSpec((1, 3, 8, Wp),
                                 lambda b, h: (b, 0, jnp.minimum((h + 1) * thb, nblk8 - 1), 0)),
                    pl.BlockSpec((1, Wp), lambda b, h: (0, 0)),
                    pl.BlockSpec((th, 1), lambda b, h: (h, 0)),
                ],
                out_specs=[
                    pl.BlockSpec((1, 1, th, Wp), lambda b, h: (b, 0, h, 0)),
                    pl.BlockSpec((1, 3, th, Wp), lambda b, h: (b, 0, h, 0)),
                ],
            ),
            compiler_params=pltpu.CompilerParams(
                dimension_semantics=("parallel", "parallel"),
                vmem_limit_bytes=vmem_limit,
            ),
        )(dmin, scale, imgs, imgs, imgs, nxmask, nymask)

    if depth_p.shape[2] != H or depth_p.shape[3] != W:
        depth_p = depth_p[:, :, :H, :W]
        normals_p = normals_p[:, :, :H, :W]
    return depth_p, normals_p


# ---------------------------------------------------------------------------
# Reference + test
# ---------------------------------------------------------------------------

def _reference(images):
    """Pure-JAX reference mirroring the PyTorch post-backbone semantics."""
    d = jnp.mean(images, axis=1, keepdims=True)
    dmin = jnp.min(d, axis=(2, 3), keepdims=True)
    dmax = jnp.max(d, axis=(2, 3), keepdims=True)
    d = (d - dmin) / (dmax - dmin + 1e-8)
    gx = jnp.zeros_like(d).at[:, :, :, 1:-1].set(
        (d[:, :, :, 2:] - d[:, :, :, :-2]) / 2)
    gy = jnp.zeros_like(d).at[:, :, 1:-1, :].set(
        (d[:, :, 2:, :] - d[:, :, :-2, :]) / 2)
    n = jnp.concatenate([-gx, -gy, jnp.ones_like(d)], axis=1)
    n = n / (jnp.sqrt(jnp.sum(n * n, axis=1, keepdims=True)) + 1e-10)
    return d, n


def _check(shape, **kwargs):
    B, _, H, W = shape
    images = jax.random.uniform(jax.random.PRNGKey(0), shape, dtype=jnp.float32)
    depth, normals = depth_estimator_forward(images, **kwargs)
    depth = jax.block_until_ready(depth)
    normals = jax.block_until_ready(normals)
    d_ref, n_ref = _reference(images)
    assert depth.shape == (B, 1, H, W)
    assert normals.shape == (B, 3, H, W)
    assert jnp.allclose(depth, d_ref, atol=1e-5, rtol=1e-5), f"depth mismatch {shape}"
    assert jnp.allclose(normals, n_ref, atol=1e-5, rtol=1e-5), f"normals mismatch {shape}"


if __name__ == "__main__":
    _check((2, 3, 16, 128))                                   # whole-image path
    _check((3, 3, 16, 128))                                   # non-divisible batch (cdiv tail)
    _check((2, 3, 16, 96))                                    # W padded to 128 + cropped
    _check((2, 3, 32, 128), force_tiled=True, tile_rows=16)   # row-tiled halo path
    print("KERNEL_OK")
</pallas_src>

<mosaic_0001>
module attributes {stable_mosaic.version = 11 : i64} {
  func.func @_whole_image_kernel(%arg0: i32, %arg1: memref<1x3x16x128xf32, #tpu.memory_space<vmem>>, %arg2: memref<1x128xf32, #tpu.memory_space<vmem>>, %arg3: memref<16x1xf32, #tpu.memory_space<vmem>>, %arg4: memref<1x1x16x128xf32, #tpu.memory_space<vmem>>, %arg5: memref<1x3x16x128xf32, #tpu.memory_space<vmem>>) attributes {dimension_semantics = [#tpu.dimension_semantics<parallel>], iteration_bounds = array<i64: 2>, scalar_prefetch = 0 : i64, scratch_operands = 0 : i64, tpu.core_type = #tpu.core_type<tc>, window_params = [{transform_indices = @transform_0, window_bounds = array<i64: 1, 3, 16, 128>}, {pipeline_mode = #tpu.pipeline_mode<synchronous>, transform_indices = @transform_1, window_bounds = array<i64: 1, 128>}, {pipeline_mode = #tpu.pipeline_mode<synchronous>, transform_indices = @transform_2, window_bounds = array<i64: 16, 1>}, {transform_indices = @transform_3, window_bounds = array<i64: 1, 1, 16, 128>}, {transform_indices = @transform_4, window_bounds = array<i64: 1, 3, 16, 128>}]} {
    %c0 = arith.constant 0 : index
    %c0_0 = arith.constant 0 : index
    %c0_1 = arith.constant 0 : index
    %c0_2 = arith.constant 0 : index
    %0 = vector.load %arg1[%c0, %c0_0, %c0_1, %c0_2] : memref<1x3x16x128xf32, #tpu.memory_space<vmem>>, vector<1x1x16x128xf32>
    %1 = vector.shape_cast %0 : vector<1x1x16x128xf32> to vector<1x16x128xf32>
    %c0_3 = arith.constant 0 : index
    %c1 = arith.constant 1 : index
    %c0_4 = arith.constant 0 : index
    %c0_5 = arith.constant 0 : index
    %2 = vector.load %arg1[%c0_3, %c1, %c0_4, %c0_5] : memref<1x3x16x128xf32, #tpu.memory_space<vmem>>, vector<1x1x16x128xf32>
    %3 = vector.shape_cast %2 : vector<1x1x16x128xf32> to vector<1x16x128xf32>
    %c0_6 = arith.constant 0 : index
    %c2 = arith.constant 2 : index
    %c0_7 = arith.constant 0 : index
    %c0_8 = arith.constant 0 : index
    %4 = vector.load %arg1[%c0_6, %c2, %c0_7, %c0_8] : memref<1x3x16x128xf32, #tpu.memory_space<vmem>>, vector<1x1x16x128xf32>
    %5 = vector.shape_cast %4 : vector<1x1x16x128xf32> to vector<1x16x128xf32>
    %6 = arith.addf %1, %3 : vector<1x16x128xf32>
    %7 = arith.addf %6, %5 : vector<1x16x128xf32>
    %cst = arith.constant 0.333333343 : f32
    %8 = vector.broadcast %cst : f32 to vector<1x16x128xf32>
    %9 = arith.mulf %7, %8 : vector<1x16x128xf32>
    %cst_9 = arith.constant dense<0x7F800000> : vector<1xf32>
    %10 = vector.multi_reduction <minimumf>, %9, %cst_9 [1, 2] : vector<1x16x128xf32> to vector<1xf32>
    %11 = vector.shape_cast %10 : vector<1xf32> to vector<1x1x1xf32>
    %cst_10 = arith.constant dense<0xFF800000> : vector<1xf32>
    %12 = vector.multi_reduction <maximumf>, %9, %cst_10 [1, 2] : vector<1x16x128xf32> to vector<1xf32>
    %13 = vector.shape_cast %12 : vector<1xf32> to vector<1x1x1xf32>
    %14 = vector.broadcast %11 : vector<1x1x1xf32> to vector<1x16x128xf32>
    %15 = arith.subf %9, %14 : vector<1x16x128xf32>
    %16 = arith.subf %13, %11 : vector<1x1x1xf32>
    %cst_11 = arith.constant 9.99999993E-9 : f32
    %17 = vector.broadcast %cst_11 : f32 to vector<1x1x1xf32>
    %18 = arith.addf %16, %17 : vector<1x1x1xf32>
    %cst_12 = arith.constant 1.000000e+00 : f32
    %19 = vector.broadcast %cst_12 : f32 to vector<1x1x1xf32>
    %20 = arith.divf %19, %18 : vector<1x1x1xf32>
    %21 = vector.broadcast %20 : vector<1x1x1xf32> to vector<1x16x128xf32>
    %22 = arith.mulf %15, %21 : vector<1x16x128xf32>
    %c127_i32 = arith.constant 127 : i32
    %23 = tpu.dynamic_rotate %22 by %c127_i32 dim 2 : vector<1x16x128xf32>, i32 -> vector<1x16x128xf32>
    %c1_i32 = arith.constant 1 : i32
    %24 = tpu.dynamic_rotate %22 by %c1_i32 dim 2 : vector<1x16x128xf32>, i32 -> vector<1x16x128xf32>
    %c15_i32 = arith.constant 15 : i32
    %25 = tpu.dynamic_rotate %22 by %c15_i32 dim 1 : vector<1x16x128xf32>, i32 -> vector<1x16x128xf32>
    %c1_i32_13 = arith.constant 1 : i32
    %26 = tpu.dynamic_rotate %22 by %c1_i32_13 dim 1 : vector<1x16x128xf32>, i32 -> vector<1x16x128xf32>
    %27 = arith.subf %23, %24 : vector<1x16x128xf32>
    %c0_14 = arith.constant 0 : index
    %c0_15 = arith.constant 0 : index
    %28 = vector.load %arg2[%c0_14, %c0_15] : memref<1x128xf32, #tpu.memory_space<vmem>>, vector<1x128xf32>
    %29 = vector.shape_cast %28 : vector<1x128xf32> to vector<1x1x128xf32>
    %30 = vector.broadcast %29 : vector<1x1x128xf32> to vector<1x16x128xf32>
    %31 = arith.mulf %27, %30 : vector<1x16x128xf32>
    %32 = arith.subf %25, %26 : vector<1x16x128xf32>
    %c0_16 = arith.constant 0 : index
    %c0_17 = arith.constant 0 : index
    %33 = vector.load %arg3[%c0_16, %c0_17] : memref<16x1xf32, #tpu.memory_space<vmem>>, vector<16x1xf32>
    %34 = vector.shape_cast %33 : vector<16x1xf32> to vector<1x16x1xf32>
    %35 = vector.broadcast %34 : vector<1x16x1xf32> to vector<1x16x128xf32>
    %36 = arith.mulf %32, %35 : vector<1x16x128xf32>
    %37 = arith.mulf %31, %31 : vector<1x16x128xf32>
    %38 = arith.mulf %36, %36 : vector<1x16x128xf32>
    %39 = arith.addf %37, %38 : vector<1x16x128xf32>
    %cst_18 = arith.constant 1.000000e+00 : f32
    %40 = vector.broadcast %cst_18 : f32 to vector<1x16x128xf32>
    %41 = arith.addf %39, %40 : vector<1x16x128xf32>
    %42 = math.rsqrt %41 : vector<1x16x128xf32>
    %c0_19 = arith.constant 0 : index
    %c0_20 = arith.constant 0 : index
    %c0_21 = arith.constant 0 : index
    %c0_22 = arith.constant 0 : index
    %43 = vector.load %arg4[%c0_19, %c0_20, %c0_21, %c0_22] : memref<1x1x16x128xf32, #tpu.memory_space<vmem>>, vector<1x1x16x128xf32>
    %44 = vector.shape_cast %43 : vector<1x1x16x128xf32> to vector<1x16x128xf32>
    %45 = vector.shape_cast %22 : vector<1x16x128xf32> to vector<1x1x16x128xf32>
    tpu.vector_store %arg4[%c0_19, %c0_20, %c0_21, %c0_22], %45 {strides = array<i32>} : memref<1x1x16x128xf32, #tpu.memory_space<vmem>>, vector<1x1x16x128xf32>,
    %46 = arith.mulf %31, %42 : vector<1x16x128xf32>
    %c0_23 = arith.constant 0 : index
    %c0_24 = arith.constant 0 : index
    %c0_25 = arith.constant 0 : index
    %c0_26 = arith.constant 0 : index
    %47 = vector.load %arg5[%c0_23, %c0_24, %c0_25, %c0_26] : memref<1x3x16x128xf32, #tpu.memory_space<vmem>>, vector<1x1x16x128xf32>
    %48 = vector.shape_cast %47 : vector<1x1x16x128xf32> to vector<1x16x128xf32>
    %49 = vector.shape_cast %46 : vector<1x16x128xf32> to vector<1x1x16x128xf32>
    tpu.vector_store %arg5[%c0_23, %c0_24, %c0_25, %c0_26], %49 {strides = array<i32>} : memref<1x3x16x128xf32, #tpu.memory_space<vmem>>, vector<1x1x16x128xf32>,
    %50 = arith.mulf %36, %42 : vector<1x16x128xf32>
    %c0_27 = arith.constant 0 : index
    %c1_28 = arith.constant 1 : index
    %c0_29 = arith.constant 0 : index
    %c0_30 = arith.constant 0 : index
    %51 = vector.load %arg5[%c0_27, %c1_28, %c0_29, %c0_30] : memref<1x3x16x128xf32, #tpu.memory_space<vmem>>, vector<1x1x16x128xf32>
    %52 = vector.shape_cast %51 : vector<1x1x16x128xf32> to vector<1x16x128xf32>
    %53 = vector.shape_cast %50 : vector<1x16x128xf32> to vector<1x1x16x128xf32>
    tpu.vector_store %arg5[%c0_27, %c1_28, %c0_29, %c0_30], %53 {strides = array<i32>} : memref<1x3x16x128xf32, #tpu.memory_space<vmem>>, vector<1x1x16x128xf32>,
    %c0_31 = arith.constant 0 : index
    %c2_32 = arith.constant 2 : index
    %c0_33 = arith.constant 0 : index
    %c0_34 = arith.constant 0 : index
    %54 = vector.load %arg5[%c0_31, %c2_32, %c0_33, %c0_34] : memref<1x3x16x128xf32, #tpu.memory_space<vmem>>, vector<1x1x16x128xf32>
    %55 = vector.shape_cast %54 : vector<1x1x16x128xf32> to vector<1x16x128xf32>
    %56 = vector.shape_cast %42 : vector<1x16x128xf32> to vector<1x1x16x128xf32>
    tpu.vector_store %arg5[%c0_31, %c2_32, %c0_33, %c0_34], %56 {strides = array<i32>} : memref<1x3x16x128xf32, #tpu.memory_space<vmem>>, vector<1x1x16x128xf32>,
    return
  }
  func.func @transform_0(%arg0: i32) -> (i32, i32, i32, i32) {
    %c0_i32 = arith.constant 0 : i32
    %c0_i32_0 = arith.constant 0 : i32
    %c0_i32_1 = arith.constant 0 : i32
    %c0_i32_2 = arith.constant 0 : i32
    return %arg0, %c0_i32, %c0_i32_0, %c0_i32_1 : i32, i32, i32, i32
  }
  func.func @transform_1(%arg0: i32) -> (i32, i32) {
    %c0_i32 = arith.constant 0 : i32
    %c0_i32_0 = arith.constant 0 : i32
    %c0_i32_1 = arith.constant 0 : i32
    return %c0_i32, %c0_i32_0 : i32, i32
  }
  func.func @transform_2(%arg0: i32) -> (i32, i32) {
    %c0_i32 = arith.constant 0 : i32
    %c0_i32_0 = arith.constant 0 : i32
    %c0_i32_1 = arith.constant 0 : i32
    return %c0_i32, %c0_i32_0 : i32, i32
  }
  func.func @transform_3(%arg0: i32) -> (i32, i32, i32, i32) {
    %c0_i32 = arith.constant 0 : i32
    %c0_i32_0 = arith.constant 0 : i32
    %c0_i32_1 = arith.constant 0 : i32
    %c0_i32_2 = arith.constant 0 : i32
    return %arg0, %c0_i32, %c0_i32_0, %c0_i32_1 : i32, i32, i32, i32
  }
  func.func @transform_4(%arg0: i32) -> (i32, i32, i32, i32) {
    %c0_i32 = arith.constant 0 : i32
    %c0_i32_0 = arith.constant 0 : i32
    %c0_i32_1 = arith.constant 0 : i32
    %c0_i32_2 = arith.constant 0 : i32
    return %arg0, %c0_i32, %c0_i32_0, %c0_i32_1 : i32, i32, i32, i32
  }
}

</mosaic_0001>

<bundles_post_ra>
// kernel: tpu_custom_call.1
= control target key start
LH: loop header
LB: loop body
LE: loop exit
PB: predicated region body
PF: predicated region fallthrough
CT: control target
= control target key end

     0   :  { %10 = vsyncpa [#allocation3], 0  ;;  %s943_s0 = inlined_call_operand.hbm [shape: f32[2,3,16,128], index: 0, kind: input, shape index: {}]   ;;  %s944_s1 = inlined_call_operand.vmem [shape: f32[1,128], index: 1, kind: input, shape index: {}]   ;;  %s945_s2 = inlined_call_operand.vmem [shape: f32[16,1], index: 2, kind: input, shape index: {}]   ;;  %s946_s3 = inlined_call_operand.hbm [shape: f32[2,1,16,128], index: 3, kind: output, shape index: {0}]   ;;  %s947_s4 = inlined_call_operand.hbm [shape: f32[2,3,16,128], index: 4, kind: output, shape index: {1}]  }
   0x1   :  { %12 = vsyncpa [#allocation3 + $0x1], 0 }
   0x2   :  { %13 = vsyncpa [#allocation4], 0 }
   0x3   :  { %15 = vsyncpa [#allocation4 + $0x1], 0 }
   0x4   :  { %16 = vsyncpa [#allocation7], 0 }
   0x5   :  { %18 = vsyncpa [#allocation7 + $0x1], 0  ;;  %s735_s15 = smov 0   ;;  %s737_s16 = smov 0  }
   0x6   :  { %s739_s17 = smov 0   ;;  %s741_s18 = smov 0  }
   0x7 LB: > { %s756_s19 = sadd.s32 4294967295, %s698_s18   ;;  %s478_s20 = sadd.s32 4294967294, %s698_s18   ;;  %s698_s18 = sphi %s741_s18, %s959_s18   ;;  %s694_s17 = sphi %s739_s17, %s958_s17   ;;  %s690_s16 = sphi %s737_s16, %s957_s16   ;;  %s686_s15 = sphi %s735_s15, %s956_s15  }
   0x8   : > { %s760_s21 = sadd.s32 1, %s698_s18   ;;  %s31_s22 = sadd.s32 1, %s694_s17 }
   0x9   : > { %s28_s23 = ssub.s32 %s698_s18, %s760_s21  ;;  %p38_p0 = scmp.ne.s32.totalorder %s694_s17, %s690_s16 }
   0xa   : > { %p29_p1 = scmp.eq.s32.totalorder %s28_s23, 0  ;;  %p39_p2 = scmp.eq.s32.totalorder %s698_s18, 0 }
   0xb   : > { %p44_p3 = scmp.ne.s32.totalorder %s690_s16, %s686_s15  ;;  %p45_p4 = scmp.eq.s32.totalorder %s756_s19, 0 }
   0xc   : > { %s772_s24 = scalar_select %p29_p1, %s694_s17, %s31_s22  }
   0xd   : > { %p40_p5 = por %p39_p2, %p38_p0  ;;  %p774_p6 = por %p45_p4, %p44_p3 }
   0xe   : > { %p110_p7 = scmp.eq.s32.totalorder %s756_s19, 1  ;;  %p116_p8 = scmp.eq.s32.totalorder %s478_s20, 1 }
   0xf   : > { %p521_p10 = scmp.lt.s32.totalorder %s698_s18, 2  ;;  %s168_s28 = sand.u32 1, %s694_s17  }
  0x10   : > { %p781_p11 = por %p110_p7, %p38_p0  ;;  %p785_p12 = por %p116_p8, %p44_p3 }
  0x11   : > { %s501_s29 = smul.u32 768, %s698_s18  ;;  %p796_p13 = pnand %p521_p10, %p40_p5 }
  0x12   : > { %s950_s26 = scalar_select %p781_p11, 1, 0 }
  0x13   : > { %s951_s27 = scalar_select %p785_p12, 1, 0 }
  0x14   : > { %s500_s30 = smul.u32 48, %s168_s28  ;;  %s794_s7 = scalar_lea.hbm %s943_s0, %s501_s29 }
  0x15   : > { %s802_s11 = scalar_lea.sflag [#allocation3], %s168_s28  ;;  %s570_s12 = scalar_lea.hbm %s794_s7, 768 }
  0x16   : > { %s172_s9 = scalar_lea.vmem [#allocation2], %s500_s30  ;;  %p571_p0 = scmp.ne.s32.totalorder %s794_s7, %s570_s12 }
  0x17   : > { %s179_s10 = sshll.u32 %s172_s9, 4  ;;  %p572_p1 = pneg %p796_p13  ;;  %s800_s10 = int_to_ptr.vmem [resolvable:$true] %s179_s10 }
  0x18   : > { %s575_s20 = scalar_lea.hbm %s943_s0, 1536  ;;  %p576_p4 = scmp.lt.u32.totalorder %s794_s7, %s943_s0 }
  0x19   : > { %p573_p2 = pnand %p572_p1, %p571_p0  ;;  %p577_p5 = scmp.lt.u32.totalorder %s575_s20, %s570_s12 }
  0x1a   : > { %p579_p8 = scmp.lt.u32.totalorder %s570_s12, %s794_s7 }
  0x1b   : > { %p574_p3 = pneg %p573_p2  ;;  %p578_p7 = por %p577_p5, %p576_p4 }
  0x1d   : > { %p580_p10 = por %p579_p8, %p578_p7 }
  0x1f   : > { %p581_p9 = pnand %p580_p10, %p574_p3 }
  0x21   : > { %584 = shalt.err (!%p581_p9)
}
  0x22   : > { %s585_s28 = scalar_lea.vmem %s800_s10, 768  ;;  %s700_s29 = smov [#allocation2]  }
  0x23   : > { %p586_p0 = scmp.ne.s32.totalorder %s800_s10, %s585_s28  ;;  %s590_s30 = sshll.u32 %s700_s29, 4  ;;  %s591_s30 = int_to_ptr.vmem [resolvable:$false] %s590_s30 }
  0x24   : > { %s592_s5 = scalar_lea.vmem %s591_s30, 1536  ;;  %p593_p11 = scmp.lt.s32.totalorder %s800_s10, %s591_s30 }
  0x25   : > { %p588_p2 = pnand %p586_p0, %p572_p1  ;;  %p594_p4 = scmp.lt.s32.totalorder %s592_s5, %s585_s28 }
  0x27   : > { %p589_p12 = pneg %p588_p2  ;;  %p595_p5 = por %p594_p4, %p593_p11 }
  0x29   : > { %p596_p7 = pnand %p595_p5, %p589_p12 }
  0x2b   : > { %599 = shalt.err (!%p596_p7)
}
  0x2c   : > { %s701_s6 = smov 128   ;;  %s702_s9 = smov 8  }
  0x2d   : > { %513 = dma.hbm_to_vmem [thread:$0]  (!%p796_p13), %s794_s7, 768, %s800_s10, %s802_s11, %s701_s6, %s701_s6, %s702_s9  }
  0x2e   : > { %p482_p9 = scmp.ge.s32.totalorder %s698_s18, 1  ;;  %p187_p1 = scmp.lt.s32.totalorder %s698_s18, 3 }
  0x30   : > { %p188_p3 = pnand %p482_p9, %p187_p1 }
  0x31   : > { %s833_s12 = sand.u32 (!%p188_p3), 1, %s690_s16  }
  0x32   : > { %191 = sbr.rel (%p188_p3) target bundleno = 403 (0x193), region = 32  ;;  %s194_s14 = scalar_lea.sflag (!%p188_p3), [#allocation3], %s833_s12 }
  0x33   : > { %s502_s13 = smul.u32 (!%p188_p3), 48, %s833_s12 }
  0x35   : > { %s197_s20 = scalar_lea.vmem (!%p188_p3), [#allocation2], %s502_s13 }
  0x39   : > { %673 = dma.done.wait (%p774_p6), %s194_s14, 768  }
  0x3a   : > { %675 = vsyncadd (%p774_p6), %s194_s14, 4294966528  ;;  %v703_v0 = vmov 0   ;;  %v227_v1 = vld [vmem:[%s197_s20] sm:$0xff]  ;;  %v228_v2 = vld [vmem:[%s197_s20 + $0x8] sm:$0xff]  ;;  %v277_v33 = vlaneseq  ;;  %s483_s11 = sshll.u32 %s833_s12, 4  ;;  %s704_s22 = smov 127  }
  0x3b   : > { %562 = vset.pattern.permute.xlu1 %v703_v0  ;;  %563 = vset.pattern.permute.xlu0 %v703_v0  ;;  %v484_v3 = vld [vmem:[%s197_s20 + $0x10] sm:$0xff]  ;;  %v485_v4 = vld [vmem:[%s197_s20 + $0x18] sm:$0xff]  ;;  %v486_v5 = vld [vmem:[%s197_s20 + $0x20] sm:$0xff]  ;;  %s219_s23 = scalar_lea.vmem [#allocation5], %s483_s11  ;;  %s705_s28 = smov 1  }
  0x3c   : > { %v487_v6 = vld [vmem:[%s197_s20 + $0x28] sm:$0xff]  ;;  %v235_v7 = vadd.f32 %v484_v3, %v227_v1  ;;  %v236_v8 = vadd.f32 %v485_v4, %v228_v2  ;;  %v300_v9 = vld [vmem:[%s945_s2] sm:$0xff]  ;;  %v278_v34 = vshrl.u32 %v277_v33, 7  ;;  %s499_s29 = sshll.u32 %s756_s19, 8  ;;  %s357_s30 = sshll.u32 %s219_s23, 4  ;;  %s856_s30 = int_to_ptr.vmem [resolvable:$true] %s357_s30 }
  0x3d   : > { %304 = vperm.xlu1 %562, %v300_v9   ;;  %v301_v12 = vld [vmem:[%s945_s2 + $0x8] sm:$0xff]  ;;  %s854_s9 = scalar_lea.hbm %s946_s3, %s499_s29  ;;  %s339_s14 = scalar_lea.sflag [#allocation4], %s833_s12 }
  0x3e   : > { %v237_v10 = vadd.f32 %v486_v5, %v235_v7  ;;  %v238_v11 = vadd.f32 %v487_v6, %v236_v8  ;;  %vm279_vm0 = vcmp.lt.s32.totalorder %v278_v34, 7  ;;  %vm284_vm1 = vcmp.lt.s32.totalorder %v278_v34, 1  ;;  %s600_s20 = scalar_lea.vmem %s856_s30, 256  ;;  %p953_p11 = scmp.ne.s32.totalorder %s950_s26, 0 }
  0x3f   : > { %p601_p6 = scmp.ne.s32.totalorder %s856_s30, %s600_s20  ;;  %s706_s7 = smov [#allocation5]  }
  0x40   : > { %v239_v13 = vmul.f32 0.33333334, %v237_v10  ;;  %v240_v14 = vmul.f32 0.33333334, %v238_v11  ;;  %s604_s8 = sshll.u32 %s706_s7, 4  ;;  %s605_s8 = int_to_ptr.vmem [resolvable:$false] %s604_s8 }
  0x41   : > { %309 = vperm.xlu1 %562, %v301_v12   ;;  %p602_p12 = pnand %p601_p6, %p953_p11  ;;  %s606_s25 = scalar_lea.vmem %s605_s8, 512 }
  0x42   : > { %v241_v15 = vmin.f32 %v239_v13, %v240_v14  ;;  %v250_v16 = vmax.f32 %v239_v13, %v240_v14  ;;  %p607_p8 = scmp.lt.s32.totalorder %s856_s30, %s605_s8  ;;  %p608_p10 = scmp.lt.s32.totalorder %s606_s25, %s600_s20 }
  0x43   : > { %p603_p13 = pneg %p602_p12 }
  0x44   : > { %242 = vmin.xlane.f32.xlu0 %v241_v15  ;;  %p609_p0 = por %p608_p10, %p607_p8 }
  0x46   : > { %p610_p2 = pnand %p609_p0, %p603_p13 }
  0x48   : > { %251 = vmax.xlane.f32.xlu0 %v250_v16 }
  0xd1   : > { %v243_v17 = vpop.xlane.xlu0 %242 }
  0xd2   : > { %v244_v18 = vrot.slane %v243_v17, 4 }
  0xd4   : > { %v245_v19 = vmin.f32 %v243_v17, %v244_v18 }
  0xd5   : > { %v252_v20 = vpop.xlane.xlu0 %251 }
  0xd6   : > { %v246_v21 = vrot.slane %v245_v19, 2  ;;  %v253_v22 = vrot.slane %v252_v20, 4 }
  0xd8   : > { %v247_v23 = vmin.f32 %v245_v19, %v246_v21  ;;  %v254_v24 = vmax.f32 %v252_v20, %v253_v22 }
  0xda   : > { %v255_v25 = vrot.slane %v254_v24, 2  ;;  %v248_v26 = vrot.slane %v247_v23, 1 }
  0xdc   : > { %v256_v27 = vmax.f32 %v254_v24, %v255_v25  ;;  %v249_v29 = vmin.f32 %v247_v23, %v248_v26 }
  0xde   : > { %v257_v28 = vrot.slane %v256_v27, 1  ;;  %v259_v35 = vsub.f32 %v239_v13, %v249_v29  ;;  %v260_v36 = vsub.f32 %v240_v14, %v249_v29 }
  0xe0   : > { %v258_v30 = vmax.f32 %v256_v27, %v257_v28 }
  0xe2   : > { %v261_v31 = vsub.f32 %v258_v30, %v249_v29 }
  0xe4   : > { %v262_v32 = vadd.f32 1e-08, %v261_v31 }
  0xe6   : > { %564 = vrcp.f32 %v262_v32 }
  0xf0   : > { %v565_v37 = vpop.eup %564 }
  0xf1   : > { %v265_v38 = vmul.f32 %v565_v37, %v259_v35  ;;  %v266_v39 = vmul.f32 %v565_v37, %v260_v36 }
  0xf3   : > { %v275_v40 = vrot.slane %v265_v38, 1  ;;  %v276_v41 = vrot.slane %v266_v39, 1  ;;  %v282_v42 = vrot.slane %v265_v38, 7  ;;  %v283_v43 = vrot.slane %v266_v39, 7  ;;  %269 = vrot.lane.b32.xlu1 %v266_v39, %s704_s22  ;;  %267 = vrot.lane.b32.xlu0 %v265_v38, %s704_s22  ;;  %324 = vst [vmem:[%s219_s23] sm:$0xff] %v265_v38  ;;  %325 = vst [vmem:[%s219_s23 + $0x8] sm:$0xff] %v266_v39 }
  0xf5   : > { %v280_v44 = vsel %vm279_vm0, %v275_v40, %v276_v41  ;;  %v286_v45 = vsel %vm284_vm1, %v283_v43, %v282_v42  ;;  %v281_v46 = vsel %vm279_vm0, %v276_v41, %v275_v40  ;;  %v285_v47 = vsel %vm284_vm1, %v282_v42, %v283_v43 }
  0xf6   : > { %v298_v48 = vsub.f32 %v280_v44, %v286_v45  ;;  %v299_v49 = vsub.f32 %v281_v46, %v285_v47 }
  0xf7   : > { %271 = vrot.lane.b32.xlu1 %v265_v38, %s705_s28 }
  0xfb   : > { %273 = vrot.lane.b32.xlu1 %v266_v39, %s705_s28 }
  0xfc   : > { %613 = shalt.err (!%p610_p2)
}
  0xfd   : > { %s614_s10 = scalar_lea.hbm %s854_s9, 256  ;;  %s618_s23 = scalar_lea.hbm %s946_s3, 512 }
  0xfe   : > { %p615_p4 = scmp.ne.s32.totalorder %s854_s9, %s614_s10  ;;  %p619_p9 = scmp.lt.u32.totalorder %s854_s9, %s946_s3 }
  0xff   : > { %p620_p1 = scmp.lt.u32.totalorder %s618_s23, %s614_s10  ;;  %p622_p6 = scmp.lt.u32.totalorder %s614_s10, %s854_s9 }
 0x100   : > { %p616_p5 = pnand %p615_p4, %p953_p11 }
 0x101   : > { %p621_p3 = por %p620_p1, %p619_p9 }
 0x102   : > { %p617_p7 = pneg %p616_p5 }
 0x103   : > { %p623_p12 = por %p622_p6, %p621_p3 }
 0x105   : > { %p624_p13 = pnand %p623_p12, %p617_p7 }
 0x107   : > { %627 = shalt.err (!%p624_p13)
}
 0x108   : > { %s707_s5 = smov 128   ;;  %s708_s6 = smov 8   ;;  %v305_v50 = vpop.permute.xlu1 %304  ;;  %v488_v54 = vld [vmem:[%s944_s1] ss:$0 sm:$0xff] }
 0x109   : > { %506 = dma.vmem_to_hbm [thread:$0]  (%p953_p11), %s856_s30, 256, %s854_s9, %s339_s14, %s707_s5, %s707_s5, %s708_s6   ;;  %v312_v56 = vmul.f32 %v305_v50, %v298_v48 }
 0x10a   : > { %s226_s30 = scalar_lea.vmem [#allocation6], %s502_s13  ;;  %s503_s14 = smul.u32 768, %s756_s19 }
 0x10b   : > { %v316_v60 = vmul.f32 %v312_v56, %v312_v56  ;;  %s373_s9 = sshll.u32 %s226_s30, 4  ;;  %s344_s10 = scalar_lea.sflag [#allocation7], %s833_s12  ;;  %s891_s9 = int_to_ptr.vmem [resolvable:$true] %s373_s9 }
 0x10c   : > { %v310_v51 = vpop.permute.xlu1 %309  ;;  %s896_s25 = scalar_lea.hbm %s947_s4, %s503_s14  ;;  %s628_s19 = scalar_lea.vmem %s891_s9, 768 }
 0x10d   : > { %v313_v61 = vmul.f32 %v310_v51, %v299_v49  ;;  %p629_p8 = scmp.ne.s32.totalorder %s891_s9, %s628_s19  ;;  %s709_s11 = smov [#allocation6]  }
 0x10e   : > { %s632_s22 = sshll.u32 %s709_s11, 4  ;;  %s633_s22 = int_to_ptr.vmem [resolvable:$false] %s632_s22 }
 0x10f   : > { %v317_v2 = vmul.f32 %v313_v61, %v313_v61  ;;  %p630_p10 = pnand %p629_p8, %p953_p11  ;;  %s634_s23 = scalar_lea.vmem %s633_s22, 1536 }
 0x110   : > { %p635_p2 = scmp.lt.s32.totalorder %s891_s9, %s633_s22  ;;  %p636_p4 = scmp.lt.s32.totalorder %s634_s23, %s628_s19 }
 0x111   : > { %p631_p0 = pneg %p630_p10 }
 0x112   : > { %p637_p5 = por %p636_p4, %p635_p2 }
 0x114   : > { %p638_p7 = pnand %p637_p5, %p631_p0 }
 0x165   : > { %v270_v52 = vpop.permute.xlu1 %269  ;;  %v268_v53 = vpop.permute.xlu0 %267 }
 0x169   : > { %v272_v55 = vpop.permute.xlu1 %271 }
 0x16a   : > { %v287_v57 = vsub.f32 %v268_v53, %v272_v55 }
 0x16c   : > { %v296_v58 = vmul.f32 %v488_v54, %v287_v57 }
 0x16d   : > { %v274_v59 = vpop.permute.xlu1 %273 }
 0x16e   : > { %v314_v62 = vmul.f32 %v296_v58, %v296_v58  ;;  %v288_v63 = vsub.f32 %v270_v52, %v274_v59 }
 0x170   : > { %v318_v0 = vadd.f32 %v316_v60, %v314_v62  ;;  %v297_v1 = vmul.f32 %v488_v54, %v288_v63 }
 0x172   : > { %v320_v3 = vadd.f32 1.0, %v318_v0  ;;  %v315_v4 = vmul.f32 %v297_v1, %v297_v1 }
 0x174   : > { %566 = vrsqrt.f32 %v320_v3  ;;  %v319_v5 = vadd.f32 %v317_v2, %v315_v4 }
 0x176   : > { %v321_v6 = vadd.f32 1.0, %v319_v5 }
 0x178   : > { %568 = vrsqrt.f32 %v321_v6 }
 0x17e   : > { %v567_v7 = vpop.eup %566 }
 0x17f   : > { %v326_v8 = vmul.f32 %v567_v7, %v296_v58  ;;  %v330_v9 = vmul.f32 %v567_v7, %v312_v56  ;;  %491 = vst [vmem:[%s226_s30 + $0x20] sm:$0xff] %v567_v7 }
 0x181   : > { %328 = vst [vmem:[%s226_s30] sm:$0xff] %v326_v8  ;;  %489 = vst [vmem:[%s226_s30 + $0x10] sm:$0xff] %v330_v9 }
 0x182   : > { %v569_v10 = vpop.eup %568 }
 0x183   : > { %v327_v11 = vmul.f32 %v569_v10, %v297_v1  ;;  %v331_v12 = vmul.f32 %v569_v10, %v313_v61  ;;  %492 = vst [vmem:[%s226_s30 + $0x28] sm:$0xff] %v569_v10 }
 0x185   : > { %329 = vst [vmem:[%s226_s30 + $0x8] sm:$0xff] %v327_v11  ;;  %490 = vst [vmem:[%s226_s30 + $0x18] sm:$0xff] %v331_v12 }
 0x186   : > { %641 = shalt.err (!%p638_p7)
}
 0x187   : > { %s642_s28 = scalar_lea.hbm %s896_s25, 768  ;;  %s646_s7 = scalar_lea.hbm %s947_s4, 1536 }
 0x188   : > { %p643_p9 = scmp.ne.s32.totalorder %s896_s25, %s642_s28  ;;  %p647_p6 = scmp.lt.u32.totalorder %s896_s25, %s947_s4 }
 0x189   : > { %p648_p12 = scmp.lt.u32.totalorder %s646_s7, %s642_s28  ;;  %p650_p8 = scmp.lt.u32.totalorder %s642_s28, %s896_s25 }
 0x18a   : > { %p644_p1 = pnand %p643_p9, %p953_p11 }
 0x18b   : > { %p649_p13 = por %p648_p12, %p647_p6 }
 0x18c   : > { %p645_p3 = pneg %p644_p1 }
 0x18d   : > { %p651_p10 = por %p650_p8, %p649_p13 }
 0x18f   : > { %p652_p0 = pnand %p651_p10, %p645_p3 }
 0x191   : > { %655 = shalt.err (!%p652_p0)
}
 0x192   : > { %507 = dma.vmem_to_hbm [thread:$0]  (%p953_p11), %s891_s9, 768, %s896_s25, %s344_s10, %s707_s5, %s707_s5, %s708_s6  }
 0x193 PF: > { %s388_s8 = sand.u32 1, %s686_s15   ;;  %p954_p2 = scmp.ne.s32.totalorder %s951_s27, 0 }
 0x194   : > { %p955_p4 = scmp.ge.s32.totalorder %s698_s18, 2  ;;  %s389_s13 = scalar_lea.sflag [#allocation4], %s388_s8 }
 0x196   : > { %p515_p5 = pnand %p955_p4, %p954_p2 }
 0x198   : > { %677 = dma.done.wait (!%p515_p5), %s389_s13, 256  }
 0x199   : > { %679 = vsyncadd (!%p515_p5), %s389_s13, 4294967040  ;;  %s398_s26 = scalar_lea.sflag [#allocation7], %s388_s8 }
 0x19a   : > { %681 = dma.done.wait (!%p515_p5), %s398_s26, 768  }
 0x19b   : > { %683 = vsyncadd (!%p515_p5), %s398_s26, 4294966528  ;;  %p21_p11 = scmp.ge.s32.totalorder %s760_s21, 4   ;;  %s956_s15 = smov %s690_s16 }
 0x19c   : > { %s957_s16 = smov %s694_s17  ;;  %s958_s17 = smov %s772_s24 }
 0x19d   : > { %s959_s18 = smov %s760_s21  ;;  %23 = sbr.rel (!%p21_p11) target bundleno = 7 (0x7), region = 98 }
 0x1a4   :  { %403 = vsyncpa [#allocation3], 1 }
 0x1a5   :  { %405 = vsyncpa [#allocation3 + $0x1], 1 }
 0x1a6   :  { %406 = vsyncpa [#allocation4], 1 }
 0x1a7   :  { %408 = vsyncpa [#allocation4 + $0x1], 1 }
 0x1a8   :  { %409 = vsyncpa [#allocation7], 1 }
 0x1a9   :  { %411 = vsyncpa [#allocation7 + $0x1], 1 }

</bundles_post_ra>
